<compile_context>
chip_gen: v7x
topology: tpu7x:2x2x1
jax: 0.10.0
libtpu: 0.0.40
codegen_flags: <defaults>
</compile_context>

<pallas_src>
import numpy as np
import jax
import jax.numpy as jnp
from jax.experimental import pallas as pl
from jax.experimental.pallas import tpu as pltpu

NEG_BIG = -1e12


# ---------------------------------------------------------------------------
# Fused per-step kernel: gate -> tree attention -> context -> score + op logits
#
# Inputs (5 packed VMEM refs):
#   act_ref   [B, 2H+2]  = [c (H) | l (H) | 1 | has_left]
#   masks_ref [B, S+N]   = [seq_mask | mask_nums]        (1.0 -> masked)
#   encp_ref  [S, B, 2H] = [enc@wa_enc + ba | enc]       (per-problem precompute)
#   e2_ref    [B, N, H]  = embedding_weight@ws_emb + bs  (per-problem precompute)
#   w_ref     [2H+2, 7H+2*OP] packed weights (see prepare_params)
# Output (1 packed VMEM ref):
#   out_ref   [B, N+OP+2H] = [num_score | op | node | context]
# ---------------------------------------------------------------------------
def _prediction_kernel(act_ref, masks_ref, encp_ref, e2_ref, w_ref, out_ref):
    f32 = jnp.float32
    S = encp_ref.shape[0]
    H = encp_ref.shape[2] // 2
    N = e2_ref.shape[1]
    OP = out_ref.shape[1] - N - 2 * H

    # ---- unpack the single packed weight buffer (static slices) -------------
    wg  = w_ref[0:2 * H + 1, 0:4 * H]                            # gate (biases in last row)
    wn  = w_ref[0:H, 4 * H:6 * H + OP]                           # node @ [wa_h | ws_node | wops_node]
    wc  = w_ref[0:H, 6 * H + OP:7 * H + 2 * OP]                  # ctx  @ [ws_ctx | wops_ctx]
    va  = w_ref[2 * H + 1:2 * H + 2, 0:H]                        # [1, H]  TreeAttn score vector
    vs  = w_ref[2 * H + 1:2 * H + 2, H:2 * H]                    # [1, H]  Score score vector
    bop = w_ref[2 * H + 1:2 * H + 2, 2 * H:2 * H + OP]           # [1, OP] op bias
    vab = w_ref[2 * H + 1:2 * H + 2, 2 * H + OP:2 * H + OP + 1]  # [1, 1]  TreeAttn score bias

    act = act_ref[...]                                           # [B, 2H+2]
    has_left = act[:, 2 * H + 1:2 * H + 2]                       # [B, 1]

    # ---- gated current node: ONE matmul (biases folded via the ones column) --
    g4 = jnp.dot(act[:, 0:2 * H + 1], wg, preferred_element_type=f32)      # [B, 4H]
    node_l = jnp.tanh(g4[:, 0:H]) * jax.nn.sigmoid(g4[:, H:2 * H])         # no-left-child path
    node_r = jnp.tanh(g4[:, 2 * H:3 * H]) * jax.nn.sigmoid(g4[:, 3 * H:4 * H])
    node = jnp.where(has_left > 0.5, node_r, node_l)                       # [B, H]

    # ---- node-side projections issued BEFORE the attention reduction ---------
    nproj = jnp.dot(node, wn, preferred_element_type=f32)                  # [B, 2H+OP]
    h_part = nproj[:, 0:H]                  # TreeAttn hidden part (ba folded into e_part)
    leaf_node = nproj[:, H:2 * H]           # Score leaf part (node half)
    op_node = nproj[:, 2 * H:2 * H + OP]    # op logits (node half)

    # ---- tree attention, native [S, B, *] orientation -------------------------
    e_part = encp_ref[:, :, 0:H]            # enc @ wa_enc + ba  (precomputed)
    enc    = encp_ref[:, :, H:2 * H]        # raw encoder outputs
    feat = jnp.tanh(e_part + h_part[None, :, :])                           # [S, B, H]
    energies = jnp.sum(feat * va[None, :, :], axis=-1) + vab               # [S, B]
    seq_mask_sb = jnp.transpose(masks_ref[:, 0:S], (1, 0))                 # [S, B]
    energies = jnp.where(seq_mask_sb > 0.5, NEG_BIG, energies)
    m = jnp.max(energies, axis=0, keepdims=True)
    p = jnp.exp(energies - m)
    attn = p / jnp.sum(p, axis=0, keepdims=True)                           # exact softmax
    context = jnp.sum(attn[:, :, None] * enc, axis=0)                      # [B, H]

    # ---- context-side projection + Score over number embeddings + op logits ---
    cproj = jnp.dot(context, wc, preferred_element_type=f32)               # [B, H+OP]
    l_part = leaf_node + cproj[:, 0:H]        # (bs folded into e_part2)
    op = op_node + cproj[:, H:H + OP] + bop                                # [B, OP]

    feat2 = jnp.tanh(e2_ref[...] + l_part[:, None, :])                     # [B, N, H]
    score = jnp.sum(feat2 * vs[None, :, :], axis=-1)                       # [B, N]
    num_score = jnp.where(masks_ref[:, S:S + N] > 0.5, NEG_BIG, score)

    # ---- single lane-dense packed output: [num_score | op | node | ctx] -------
    out_ref[:, 0:N] = num_score
    out_ref[:, N:N + OP] = op
    out_ref[:, N + OP:N + OP + H] = node
    out_ref[:, N + OP + H:N + OP + 2 * H] = context


# ---------------------------------------------------------------------------
# One-time weight packing (per model) -> a single [2H+2, 7H+2*OP] buffer
# ---------------------------------------------------------------------------
def prepare_params(params):
    H = params['wl'].shape[0]
    OP = params['wops'].shape[1]
    f32 = jnp.float32
    Z = lambda r, c: jnp.zeros((r, c), f32)

    # gate block [2H+1, 4H]; matmul LHS is [c | l | 1]
    gate_c = jnp.concatenate([params['wl'], params['wlg'],
                              params['wr'][H:2 * H], params['wrg'][H:2 * H]], axis=1)
    gate_l = jnp.concatenate([Z(H, H), Z(H, H),
                              params['wr'][0:H], params['wrg'][0:H]], axis=1)
    gate_b = jnp.concatenate([params['bl'], params['blg'],
                              params['br'], params['brg']], axis=1)
    w_gate = jnp.concatenate([gate_c, gate_l, gate_b], axis=0)             # [2H+1, 4H]

    # node block [H, 2H+OP] = [wa_h | ws_node | wops_node]
    w_node = jnp.concatenate([params['wa'][0:H], params['ws'][0:H],
                              params['wops'][0:H]], axis=1)
    # ctx block [H, H+OP] = [ws_ctx | wops_ctx]
    w_ctx = jnp.concatenate([params['ws'][H:2 * H], params['wops'][H:2 * H]], axis=1)

    # vector row (requires 2H >= OP + 1): [va | vs | bops | va_b | zero-pad] -> width 4H
    vec_row = jnp.concatenate([params['va'].T, params['vs'].T, params['bops'],
                               params['va_b'], Z(1, 4 * H - (2 * H + OP + 1))], axis=1)

    w_big = jnp.concatenate([
        jnp.concatenate([w_gate, vec_row], axis=0),                 # [2H+2, 4H]
        jnp.concatenate([w_node, Z(H + 2, 2 * H + OP)], axis=0),    # [2H+2, 2H+OP]
        jnp.concatenate([w_ctx, Z(H + 2, H + OP)], axis=0),         # [2H+2, H+OP]
    ], axis=1).astype(f32)

    return {
        'w_big': w_big,
        # pieces consumed by the once-per-problem precompute
        'emb_const': params['embedding_weight'],   # [1, n_const, H]
        'wa_enc': params['wa'][H:2 * H],           # [H, H]
        'ba': params['ba'],                        # [1, H]
        'ws_emb': params['ws'][2 * H:3 * H],       # [H, H]
        'bs': params['bs'],                        # [1, H]
    }


# ---------------------------------------------------------------------------
# Once-per-problem precompute (loop-invariant across decode steps; plain XLA)
# ---------------------------------------------------------------------------
def prepare_problem(packed, encoder_outputs_sbh, num_pades, seq_mask, mask_nums):
    S, B, H = encoder_outputs_sbh.shape
    n_const = packed['emb_const'].shape[1]
    embedding_weight = jnp.concatenate(
        [jnp.broadcast_to(packed['emb_const'], (B, n_const, H)), num_pades], axis=1)   # [B, N, H]
    # hoisted projections (do NOT depend on the decode step)
    e_part = jnp.einsum('sbh,hk->sbk', encoder_outputs_sbh, packed['wa_enc']) + packed['ba']
    enc_pack = jnp.concatenate([e_part, encoder_outputs_sbh], axis=2)                  # [S, B, 2H]
    e_part2 = jnp.einsum('bnh,hk->bnk', embedding_weight, packed['ws_emb']) + packed['bs']
    masks = jnp.concatenate([seq_mask, mask_nums], axis=1)                             # [B, S+N]
    return {'enc_pack': enc_pack, 'e_part2': e_part2, 'masks': masks,
            'embedding_weight': embedding_weight}


# ---------------------------------------------------------------------------
# Per-decode-step call (one fused pallas_call: 5 input DMAs + 1 output DMA)
# ---------------------------------------------------------------------------
def prediction_step(packed, problem, c, l, has_left):
    B, H = c.shape
    N = problem['e_part2'].shape[1]
    OP = (packed['w_big'].shape[1] - 7 * H) // 2
    act = jnp.concatenate([c, l, jnp.ones((B, 1), jnp.float32), has_left], axis=1)     # [B, 2H+2]

    out = pl.pallas_call(
        _prediction_kernel,
        out_shape=jax.ShapeDtypeStruct((B, N + OP + 2 * H), jnp.float32),
        in_specs=[pl.BlockSpec(memory_space=pltpu.MemorySpace.VMEM)] * 5,
        out_specs=pl.BlockSpec(memory_space=pltpu.MemorySpace.VMEM),
    )(act, problem['masks'], problem['enc_pack'], problem['e_part2'], packed['w_big'])

    num_score = out[:, 0:N]
    op = out[:, N:N + OP]
    node = out[:, N + OP:N + OP + H][:, None, :]
    ctx = out[:, N + OP + H:N + OP + 2 * H][:, None, :]
    return num_score, op, node, ctx


# ---------------------------------------------------------------------------
# Full Prediction.forward equivalent (precompute + fused step kernel)
# ---------------------------------------------------------------------------
def prediction_forward(packed, c, l, has_left, encoder_outputs_sbh, num_pades,
                       seq_mask, mask_nums):
    """
    c, l      : [B, H]  current-node / left-child embeddings (zeros where None)
    has_left  : [B, 1]  1.0 where the left child exists
    encoder_outputs_sbh : [S, B, H]  (PyTorch layout)
    num_pades : [B, num_size, H];  seq_mask: [B, S];  mask_nums: [B, N]
    """
    problem = prepare_problem(packed, encoder_outputs_sbh, num_pades, seq_mask, mask_nums)
    num_score, op, node, ctx = prediction_step(packed, problem, c, l, has_left)
    return num_score, op, node, ctx, problem['embedding_weight']


# ---------------------------------------------------------------------------
# Pure-JAX reference (mirrors the PyTorch code) for a correctness check
# ---------------------------------------------------------------------------
def prediction_forward_ref(params, c, l, has_left, encoder_outputs_sbh, num_pades,
                           seq_mask, mask_nums):
    B, H = c.shape
    enc = jnp.transpose(encoder_outputs_sbh, (1, 0, 2))
    lc = jnp.concatenate([l, c], axis=1)
    g0 = jnp.tanh(c @ params['wl'] + params['bl'])
    t0 = jax.nn.sigmoid(c @ params['wlg'] + params['blg'])
    g1 = jnp.tanh(lc @ params['wr'] + params['br'])
    t1 = jax.nn.sigmoid(lc @ params['wrg'] + params['brg'])
    node = jnp.where(has_left > 0.5, g1 * t1, g0 * t0)

    e_in = jnp.concatenate([jnp.broadcast_to(node[:, None, :], enc.shape), enc], axis=2)
    feat = jnp.tanh(e_in @ params['wa'] + params['ba'])
    en = (feat @ params['va'])[..., 0] + params['va_b'][0, 0]
    en = jnp.where(seq_mask > 0.5, NEG_BIG, en)
    attn = jax.nn.softmax(en, axis=1)
    ctx = jnp.einsum('bs,bsh->bh', attn, enc)

    emb_w = jnp.concatenate(
        [jnp.broadcast_to(params['embedding_weight'],
                          (B,) + params['embedding_weight'].shape[1:]), num_pades], axis=1)
    leaf = jnp.concatenate([node, ctx], axis=1)
    e2 = jnp.concatenate([jnp.broadcast_to(leaf[:, None, :],
                                           (B, emb_w.shape[1], 2 * H)), emb_w], axis=2)
    f2 = jnp.tanh(e2 @ params['ws'] + params['bs'])
    ns = (f2 @ params['vs'])[..., 0]
    ns = jnp.where(mask_nums > 0.5, NEG_BIG, ns)
    op = leaf @ params['wops'] + params['bops']
    return ns, op, node[:, None, :], ctx[:, None, :], emb_w


# ---------------------------------------------------------------------------
# Deterministic parameter construction
# ---------------------------------------------------------------------------
def make_params(key, hidden_size, op_nums, input_size):
    H = hidden_size
    ks = jax.random.split(key, 16)
    n = lambda k, shape, s=0.1: (s * jax.random.normal(k, shape)).astype(jnp.float32)
    return {
        'embedding_weight': n(ks[0], (1, input_size, H), 1.0),   # torch.randn
        'wl':  n(ks[1], (H, H)),      'bl':  n(ks[2], (1, H)),
        'wr':  n(ks[3], (2 * H, H)),  'br':  n(ks[4], (1, H)),
        'wlg': n(ks[5], (H, H)),      'blg': n(ks[6], (1, H)),
        'wrg': n(ks[7], (2 * H, H)),  'brg': n(ks[8], (1, H)),
        'wops': n(ks[9], (2 * H, op_nums)), 'bops': n(ks[10], (1, op_nums)),
        # TreeAttn(hidden, hidden): attn Linear(2H, H), score Linear(H, 1) with bias
        'wa': n(ks[11], (2 * H, H)), 'ba': n(ks[12], (1, H)),
        'va': n(ks[13], (H, 1)),     'va_b': n(ks[14], (1, 1)),
        # Score(2H, H): attn Linear(3H, H), score Linear(H, 1) no bias
        'ws': n(ks[15], (3 * H, H)),
        'bs': n(jax.random.fold_in(key, 100), (1, H)),
        'vs': n(jax.random.fold_in(key, 101), (H, 1)),
    }


if __name__ == "__main__":
    B, H, S = 2, 32, 8
    n_const, num_size, op_nums = 3, 5, 4
    N = n_const + num_size

    key = jax.random.PRNGKey(0)
    kp, k1, k2, k3, k4, k5 = jax.random.split(key, 6)
    params = make_params(kp, H, op_nums, n_const)
    packed = prepare_params(params)   # one-time weight packing (loop-invariant)

    encoder_outputs = jax.random.normal(k1, (S, B, H), jnp.float32)   # PyTorch [S, B, H]
    num_pades = jax.random.normal(k2, (B, num_size, H), jnp.float32)
    padding_hidden = jnp.zeros((1, H), jnp.float32)

    # node_stacks: batch 0 empty (-> padding_hidden), batch 1 has a node embedding
    node_emb_1 = jax.random.normal(k3, (1, H), jnp.float32)
    current_embeddings = [padding_hidden, node_emb_1]
    # left_childs: batch 0 -> None, batch 1 -> a left-child embedding
    left_1 = jax.random.normal(k4, (1, H), jnp.float32)
    left_childs = [None, left_1]

    c = jnp.concatenate(current_embeddings, axis=0)                               # [B, H]
    l = jnp.concatenate([jnp.zeros((1, H), jnp.float32) if lc is None else lc
                         for lc in left_childs], axis=0)                          # [B, H]
    has_left = jnp.array([[0.0 if lc is None else 1.0] for lc in left_childs],
                         jnp.float32)                                             # [B, 1]

    seq_mask = jnp.zeros((B, S), jnp.float32).at[:, S - 2:].set(1.0)              # mask last 2
    mask_nums = jnp.zeros((B, N), jnp.float32).at[1, N - 1:].set(1.0)

    fwd = jax.jit(prediction_forward)
    outs = fwd(packed, c, l, has_left, encoder_outputs, num_pades, seq_mask, mask_nums)
    outs = jax.block_until_ready(outs)

    refs = prediction_forward_ref(params, c, l, has_left, encoder_outputs, num_pades,
                                  seq_mask, mask_nums)
    # tolerance covers XLA default-precision dots in the ref / precompute vs MXU f32
    for o, r in zip(outs, refs):
        np.testing.assert_allclose(np.asarray(o), np.asarray(r), rtol=5e-3, atol=5e-3)

    print("KERNEL_OK")
</pallas_src>

<mosaic_0001>
module attributes {stable_mosaic.version = 11 : i64} {
  func.func @_prediction_kernel(%arg0: memref<2x66xf32, #tpu.memory_space<vmem>>, %arg1: memref<2x16xf32, #tpu.memory_space<vmem>>, %arg2: memref<8x2x64xf32, #tpu.memory_space<vmem>>, %arg3: memref<2x8x32xf32, #tpu.memory_space<vmem>>, %arg4: memref<66x232xf32, #tpu.memory_space<vmem>>, %arg5: memref<2x76xf32, #tpu.memory_space<vmem>>) attributes {dimension_semantics = [], scalar_prefetch = 0 : i64, scratch_operands = 0 : i64, tpu.core_type = #tpu.core_type<tc>} {
    %c0 = arith.constant 0 : index
    %c0_0 = arith.constant 0 : index
    %0 = vector.load %arg4[%c0, %c0_0] : memref<66x232xf32, #tpu.memory_space<vmem>>, vector<65x128xf32>
    %c0_1 = arith.constant 0 : index
    %c128 = arith.constant 128 : index
    %1 = vector.load %arg4[%c0_1, %c128] : memref<66x232xf32, #tpu.memory_space<vmem>>, vector<32x68xf32>
    %c0_2 = arith.constant 0 : index
    %c196 = arith.constant 196 : index
    %2 = vector.load %arg4[%c0_2, %c196] : memref<66x232xf32, #tpu.memory_space<vmem>>, vector<32x36xf32>
    %c65 = arith.constant 65 : index
    %c0_3 = arith.constant 0 : index
    %3 = vector.load %arg4[%c65, %c0_3] : memref<66x232xf32, #tpu.memory_space<vmem>>, vector<1x32xf32>
    %c65_4 = arith.constant 65 : index
    %c32 = arith.constant 32 : index
    %4 = vector.load %arg4[%c65_4, %c32] : memref<66x232xf32, #tpu.memory_space<vmem>>, vector<1x32xf32>
    %c65_5 = arith.constant 65 : index
    %c64 = arith.constant 64 : index
    %5 = vector.load %arg4[%c65_5, %c64] : memref<66x232xf32, #tpu.memory_space<vmem>>, vector<1x4xf32>
    %c65_6 = arith.constant 65 : index
    %c68 = arith.constant 68 : index
    %6 = vector.load %arg4[%c65_6, %c68] : memref<66x232xf32, #tpu.memory_space<vmem>>, vector<1x1xf32>
    %c0_7 = arith.constant 0 : index
    %c0_8 = arith.constant 0 : index
    %7 = vector.load %arg0[%c0_7, %c0_8] : memref<2x66xf32, #tpu.memory_space<vmem>>, vector<2x66xf32>
    %8 = vector.extract_strided_slice %7 {offsets = [0, 65], sizes = [2, 1], strides = [1, 1]} : vector<2x66xf32> to vector<2x1xf32>
    %9 = vector.extract_strided_slice %7 {offsets = [0, 0], sizes = [2, 65], strides = [1, 1]} : vector<2x66xf32> to vector<2x65xf32>
    %cst = arith.constant dense<0.000000e+00> : vector<2x128xf32>
    %10 = tpu.matmul %9, %0, %cst {dimension_numbers = #tpu.dot_dimension_numbers<[1], [0], [0], [1], [0, 0, 1, 1], [], []>} : vector<2x65xf32>, vector<65x128xf32>, vector<2x128xf32> -> vector<2x128xf32>
    %11 = vector.extract_strided_slice %10 {offsets = [0, 0], sizes = [2, 32], strides = [1, 1]} : vector<2x128xf32> to vector<2x32xf32>
    %12 = math.tanh %11 : vector<2x32xf32>
    %13 = vector.extract_strided_slice %10 {offsets = [0, 32], sizes = [2, 32], strides = [1, 1]} : vector<2x128xf32> to vector<2x32xf32>
    %14 = arith.negf %13 : vector<2x32xf32>
    %15 = math.exp %14 : vector<2x32xf32>
    %cst_9 = arith.constant 1.000000e+00 : f32
    %16 = vector.broadcast %cst_9 : f32 to vector<2x32xf32>
    %17 = arith.addf %16, %15 : vector<2x32xf32>
    %18 = arith.divf %16, %17 : vector<2x32xf32>
    %19 = arith.mulf %12, %18 : vector<2x32xf32>
    %20 = vector.extract_strided_slice %10 {offsets = [0, 64], sizes = [2, 32], strides = [1, 1]} : vector<2x128xf32> to vector<2x32xf32>
    %21 = math.tanh %20 : vector<2x32xf32>
    %22 = vector.extract_strided_slice %10 {offsets = [0, 96], sizes = [2, 32], strides = [1, 1]} : vector<2x128xf32> to vector<2x32xf32>
    %23 = arith.negf %22 : vector<2x32xf32>
    %24 = math.exp %23 : vector<2x32xf32>
    %cst_10 = arith.constant 1.000000e+00 : f32
    %25 = vector.broadcast %cst_10 : f32 to vector<2x32xf32>
    %26 = arith.addf %25, %24 : vector<2x32xf32>
    %27 = arith.divf %25, %26 : vector<2x32xf32>
    %28 = arith.mulf %21, %27 : vector<2x32xf32>
    %cst_11 = arith.constant 5.000000e-01 : f32
    %29 = vector.broadcast %cst_11 : f32 to vector<2x1xf32>
    %30 = arith.cmpf ogt, %8, %29 : vector<2x1xf32>
    %31 = vector.shape_cast %30 : vector<2x1xi1> to vector<2x1xi1>
    %32 = vector.broadcast %31 : vector<2x1xi1> to vector<2x32xi1>
    %33 = arith.select %32, %28, %19 : vector<2x32xi1>, vector<2x32xf32>
    %cst_12 = arith.constant dense<0.000000e+00> : vector<2x68xf32>
    %34 = tpu.matmul %33, %1, %cst_12 {dimension_numbers = #tpu.dot_dimension_numbers<[1], [0], [0], [1], [0, 0, 1, 1], [], []>} : vector<2x32xf32>, vector<32x68xf32>, vector<2x68xf32> -> vector<2x68xf32>
    %35 = vector.extract_strided_slice %34 {offsets = [0, 0], sizes = [2, 32], strides = [1, 1]} : vector<2x68xf32> to vector<2x32xf32>
    %36 = vector.extract_strided_slice %34 {offsets = [0, 32], sizes = [2, 32], strides = [1, 1]} : vector<2x68xf32> to vector<2x32xf32>
    %37 = vector.extract_strided_slice %34 {offsets = [0, 64], sizes = [2, 4], strides = [1, 1]} : vector<2x68xf32> to vector<2x4xf32>
    %c0_13 = arith.constant 0 : index
    %c0_14 = arith.constant 0 : index
    %c0_15 = arith.constant 0 : index
    %38 = vector.load %arg2[%c0_13, %c0_14, %c0_15] : memref<8x2x64xf32, #tpu.memory_space<vmem>>, vector<8x2x32xf32>
    %c0_16 = arith.constant 0 : index
    %c0_17 = arith.constant 0 : index
    %c32_18 = arith.constant 32 : index
    %39 = vector.load %arg2[%c0_16, %c0_17, %c32_18] : memref<8x2x64xf32, #tpu.memory_space<vmem>>, vector<8x2x32xf32>
    %40 = vector.shape_cast %35 : vector<2x32xf32> to vector<1x2x32xf32>
    %41 = vector.broadcast %40 : vector<1x2x32xf32> to vector<8x2x32xf32>
    %42 = arith.addf %38, %41 : vector<8x2x32xf32>
    %43 = math.tanh %42 : vector<8x2x32xf32>
    %44 = vector.shape_cast %3 : vector<1x32xf32> to vector<1x1x32xf32>
    %45 = vector.broadcast %44 : vector<1x1x32xf32> to vector<8x2x32xf32>
    %46 = arith.mulf %43, %45 : vector<8x2x32xf32>
    %cst_19 = arith.constant dense<0.000000e+00> : vector<8x2xf32>
    %47 = vector.multi_reduction <add>, %46, %cst_19 [2] : vector<8x2x32xf32> to vector<8x2xf32>
    %48 = vector.broadcast %6 : vector<1x1xf32> to vector<8x2xf32>
    %49 = arith.addf %47, %48 : vector<8x2xf32>
    %c0_20 = arith.constant 0 : index
    %c0_21 = arith.constant 0 : index
    %50 = vector.load %arg1[%c0_20, %c0_21] : memref<2x16xf32, #tpu.memory_space<vmem>>, vector<2x8xf32>
    %51 = tpu.transpose %50, [1, 0] : vector<2x8xf32> -> vector<8x2xf32>
    %cst_22 = arith.constant 5.000000e-01 : f32
    %52 = vector.broadcast %cst_22 : f32 to vector<8x2xf32>
    %53 = arith.cmpf ogt, %51, %52 : vector<8x2xf32>
    %cst_23 = arith.constant -9.99999995E+11 : f32
    %54 = vector.broadcast %cst_23 : f32 to vector<8x2xf32>
    %55 = arith.select %53, %54, %49 : vector<8x2xi1>, vector<8x2xf32>
    %cst_24 = arith.constant dense<0xFF800000> : vector<2xf32>
    %56 = vector.multi_reduction <maximumf>, %55, %cst_24 [0] : vector<8x2xf32> to vector<2xf32>
    %57 = vector.shape_cast %56 : vector<2xf32> to vector<1x2xf32>
    %58 = vector.broadcast %57 : vector<1x2xf32> to vector<8x2xf32>
    %59 = arith.subf %55, %58 : vector<8x2xf32>
    %60 = math.exp %59 : vector<8x2xf32>
    %cst_25 = arith.constant dense<0.000000e+00> : vector<2xf32>
    %61 = vector.multi_reduction <add>, %60, %cst_25 [0] : vector<8x2xf32> to vector<2xf32>
    %62 = vector.shape_cast %61 : vector<2xf32> to vector<1x2xf32>
    %63 = vector.broadcast %62 : vector<1x2xf32> to vector<8x2xf32>
    %64 = arith.divf %60, %63 : vector<8x2xf32>
    %65 = vector.shape_cast %64 : vector<8x2xf32> to vector<8x2x1xf32>
    %66 = vector.broadcast %65 : vector<8x2x1xf32> to vector<8x2x32xf32>
    %67 = arith.mulf %66, %39 : vector<8x2x32xf32>
    %cst_26 = arith.constant dense<0.000000e+00> : vector<2x32xf32>
    %68 = vector.multi_reduction <add>, %67, %cst_26 [0] : vector<8x2x32xf32> to vector<2x32xf32>
    %cst_27 = arith.constant dense<0.000000e+00> : vector<2x36xf32>
    %69 = tpu.matmul %68, %2, %cst_27 {dimension_numbers = #tpu.dot_dimension_numbers<[1], [0], [0], [1], [0, 0, 1, 1], [], []>} : vector<2x32xf32>, vector<32x36xf32>, vector<2x36xf32> -> vector<2x36xf32>
    %70 = vector.extract_strided_slice %69 {offsets = [0, 0], sizes = [2, 32], strides = [1, 1]} : vector<2x36xf32> to vector<2x32xf32>
    %71 = arith.addf %36, %70 : vector<2x32xf32>
    %72 = vector.extract_strided_slice %69 {offsets = [0, 32], sizes = [2, 4], strides = [1, 1]} : vector<2x36xf32> to vector<2x4xf32>
    %73 = arith.addf %37, %72 : vector<2x4xf32>
    %74 = vector.broadcast %5 : vector<1x4xf32> to vector<2x4xf32>
    %75 = arith.addf %73, %74 : vector<2x4xf32>
    %c0_28 = arith.constant 0 : index
    %c0_29 = arith.constant 0 : index
    %c0_30 = arith.constant 0 : index
    %76 = vector.load %arg3[%c0_28, %c0_29, %c0_30] : memref<2x8x32xf32, #tpu.memory_space<vmem>>, vector<2x8x32xf32>
    %77 = vector.shape_cast %71 : vector<2x32xf32> to vector<2x1x32xf32>
    %78 = vector.broadcast %77 : vector<2x1x32xf32> to vector<2x8x32xf32>
    %79 = arith.addf %76, %78 : vector<2x8x32xf32>
    %80 = math.tanh %79 : vector<2x8x32xf32>
    %81 = vector.shape_cast %4 : vector<1x32xf32> to vector<1x1x32xf32>
    %82 = vector.broadcast %81 : vector<1x1x32xf32> to vector<2x8x32xf32>
    %83 = arith.mulf %80, %82 : vector<2x8x32xf32>
    %cst_31 = arith.constant dense<0.000000e+00> : vector<2x8xf32>
    %84 = vector.multi_reduction <add>, %83, %cst_31 [2] : vector<2x8x32xf32> to vector<2x8xf32>
    %c0_32 = arith.constant 0 : index
    %c8 = arith.constant 8 : index
    %85 = vector.load %arg1[%c0_32, %c8] : memref<2x16xf32, #tpu.memory_space<vmem>>, vector<2x8xf32>
    %cst_33 = arith.constant 5.000000e-01 : f32
    %86 = vector.broadcast %cst_33 : f32 to vector<2x8xf32>
    %87 = arith.cmpf ogt, %85, %86 : vector<2x8xf32>
    %cst_34 = arith.constant -9.99999995E+11 : f32
    %88 = vector.broadcast %cst_34 : f32 to vector<2x8xf32>
    %89 = arith.select %87, %88, %84 : vector<2x8xi1>, vector<2x8xf32>
    %c0_35 = arith.constant 0 : index
    %c0_36 = arith.constant 0 : index
    %90 = vector.load %arg5[%c0_35, %c0_36] : memref<2x76xf32, #tpu.memory_space<vmem>>, vector<2x8xf32>
    tpu.vector_store %arg5[%c0_35, %c0_36], %89 {strides = array<i32>} : memref<2x76xf32, #tpu.memory_space<vmem>>, vector<2x8xf32>,
    %c0_37 = arith.constant 0 : index
    %c8_38 = arith.constant 8 : index
    %91 = vector.load %arg5[%c0_37, %c8_38] : memref<2x76xf32, #tpu.memory_space<vmem>>, vector<2x4xf32>
    tpu.vector_store %arg5[%c0_37, %c8_38], %75 {strides = array<i32>} : memref<2x76xf32, #tpu.memory_space<vmem>>, vector<2x4xf32>,
    %c0_39 = arith.constant 0 : index
    %c12 = arith.constant 12 : index
    %92 = vector.load %arg5[%c0_39, %c12] : memref<2x76xf32, #tpu.memory_space<vmem>>, vector<2x32xf32>
    tpu.vector_store %arg5[%c0_39, %c12], %33 {strides = array<i32>} : memref<2x76xf32, #tpu.memory_space<vmem>>, vector<2x32xf32>,
    %c0_40 = arith.constant 0 : index
    %c44 = arith.constant 44 : index
    %93 = vector.load %arg5[%c0_40, %c44] : memref<2x76xf32, #tpu.memory_space<vmem>>, vector<2x32xf32>
    tpu.vector_store %arg5[%c0_40, %c44], %68 {strides = array<i32>} : memref<2x76xf32, #tpu.memory_space<vmem>>, vector<2x32xf32>,
    return
  }
}

</mosaic_0001>

<bundles_post_ra>
// kernel: prediction_forward.1
= control target key start
LH: loop header
LB: loop body
LE: loop exit
PB: predicated region body
PF: predicated region fallthrough
CT: control target
= control target key end

     0   :  { %v816_v0 = vmov 0.0|0.0   ;;  %vm817_vm0 = vmmov 0   ;;  %v818_v4 = vmov 0.0   ;;  %vm39_vm1 = vcmask 1040384   ;;  %s820_s13 = smov 96   ;;  %s822_s21 = smov 64   ;;  %s1103_s4 = inlined_call_operand.vmem [shape: f32[66,232], index: 4, kind: input, shape index: {}]   ;;  %s1104_s0 = inlined_call_operand.vmem [shape: f32[2,66], index: 0, kind: input, shape index: {}]   ;;  %s1105_s2 = inlined_call_operand.vmem [shape: f32[8,2,64], index: 2, kind: input, shape index: {}]   ;;  %s1106_s1 = inlined_call_operand.vmem [shape: f32[2,16], index: 1, kind: input, shape index: {}]   ;;  %s1107_s3 = inlined_call_operand.vmem [shape: f32[2,8,32], index: 3, kind: input, shape index: {}]   ;;  %s1108_s5 = inlined_call_operand.vmem [shape: f32[2,76], index: 5, kind: output, shape index: {}]  }
   0x1   :  { %735 = vmatprep.subr.bf16.mxu0 %v816_v0  ;;  %v20_v1 = vld [vmem:[%s1103_s4] sm:$0xff]  ;;  %v21_v2 = vld [vmem:[%s1103_s4 + $0x10] sm:$0xff]  ;;  %710 = vmatprep.mubr.msk.f32.mxu0 %vm817_vm0, %v818_v4  ;;  %vm35_vm2 = vcmask 531456   ;;  %v819_v16 = vmov 65   ;;  %v821_v23 = vmov 0   ;;  %v905_v25 = vld [vmem:[%s1103_s4 + $0x8] sm:$0xff] }
   0x2   :  { %v22_v3 = vld [vmem:[%s1103_s4 + $0x20] sm:$0xff]  ;;  %v736_v5 = vpack.c.bf16 %v21_v2, %v20_v1  ;;  %v23_v6 = vld [vmem:[%s1103_s4 + $0x30] sm:$0xff]  ;;  %747 = vmatprep.subr.bf16.mxu1 %v816_v0  ;;  %721 = vmatprep.mubr.msk.f32.mxu1 %vm817_vm0, %v818_v4  ;;  %v910_v26 = vld [vmem:[%s1103_s4 + $0x18] sm:$0xff]  ;;  %vm139_vm5 = vcmask 261120   ;;  %v823_v39 = vmov 68   ;;  %vm244_vm6 = vcmask 254976  }
   0x3   :  { %v739_v7 = vpack.c.bf16 %v23_v6, %v22_v3  ;;  %v24_v8 = vld [vmem:[%s1103_s4 + $0x40] sm:$0xff]  ;;  %v25_v9 = vld [vmem:[%s1103_s4 + $0x50] sm:$0xff]  ;;  %774 = vset.pattern.permute.xlu0 %v819_v16  ;;  %v915_v27 = vld [vmem:[%s1103_s4 + $0x28] sm:$0xff]  ;;  %v776_v28 = vpack.i.bf16 %v910_v26, %v905_v25  ;;  %v748_v29 = vpack.c.bf16 %v910_v26, %v905_v25  ;;  %vm358_vm7 = vcmask 1041409   ;;  %s824_s15 = smov 60   ;;  %s825_s16 = smov 32  }
   0x4   :  { %737 = vmatpush3.bf16.msra.mxu0 %v736_v5  ;;  %v742_v10 = vpack.c.bf16 %v25_v9, %v24_v8  ;;  %v26_v11 = vld [vmem:[%s1103_s4 + $0x60] sm:$0xff]  ;;  %v27_v12 = vld [vmem:[%s1103_s4 + $0x70] sm:$0xff]  ;;  %v924_v30 = vld [vmem:[%s1103_s4 + $0x38] sm:$0xff]  ;;  %vm360_vm8 = vcmask 1042434   ;;  %vm362_vm9 = vcmask 1043459   ;;  %vm364_vm10 = vcmask 1044484  }
   0x5   :  { %738 = vmatprep.subr.bf16.mxu0 %v816_v0  ;;  %v745_v13 = vpack.c.bf16 %v27_v12, %v26_v11  ;;  %v28_v14 = vld [vmem:[%s1103_s4 + $0x80] sm:$0x1]  ;;  %749 = vmatpush3.bf16.msra.mxu1 %v748_v29  ;;  %v751_v31 = vpack.c.bf16 %v924_v30, %v915_v27  ;;  %v939_v40 = vld [vmem:[%s1105_s2 + $0x2] sm:$0x3]  ;;  %v949_v42 = vld [vmem:[%s1105_s2 + $0x4] sm:$0x3] }
   0x6   :  { %v34_v15 = vld [vmem:[%s1104_s0] sm:$0x3]  ;;  %750 = vmatprep.subr.bf16.mxu1 %v816_v0  ;;  %v954_v43 = vld [vmem:[%s1105_s2 + $0x6] sm:$0x3]  ;;  %v961_v45 = vld [vmem:[%s1105_s2 + $0x8] sm:$0x3] }
   0x7   :  { %vm125_vm3 = vcmp.gt.f32.partialorder %v34_v15, 0.5  ;;  %v944_v41 = vld [vmem:[%s1105_s2] sm:$0x3]  ;;  %v972_v50 = vld [vmem:[%s1105_s2 + $0xa] sm:$0x3]  ;;  %vm366_vm11 = vcmask 1045509  }
   0x8   :  { %740 = vmatpush3.bf16.msra.mxu0 %v739_v7  ;;  %v126_v24 = vsel %vm125_vm3, 1, %v821_v23  ;;  %v983_v54 = vld [vmem:[%s1105_s2 + $0xc] sm:$0x3]  ;;  %v988_v55 = vld [vmem:[%s1105_s2 + $0xe] sm:$0x3]  ;;  %vm368_vm12 = vcmask 1046534  }
   0x9   :  { %741 = vmatprep.subr.bf16.mxu0 %v816_v0  ;;  %752 = vmatpush3.bf16.msra.mxu1 %v751_v31  ;;  %v997_v58 = vld [vmem:[%s1103_s4 + $0x81] ss:$0 sm:$0xff]  ;;  %vm370_vm13 = vcmask 1047559   ;;  %vm374_vm14 = vcmask 15360   ;;  %s829_s23 = smov 120   ;;  %s830_s24 = smov 12  }
   0xa   :  { %753 = vmatprep.subr.bf16.mxu1 %v816_v0  ;;  %vm651_vm3 = vcmask 91200  }
   0xc   :  { %743 = vmatpush3.bf16.msra.mxu0 %v742_v10 }
   0xd   :  { %744 = vmatprep.subr.bf16.mxu0 %v816_v0 }
  0x10   :  { %746 = vmatpush3.bf16.msra.mxu0 %v745_v13 }
  0x11   :  { %708 = vmatprep.subr.mxu0 %v818_v4 }
  0x14   :  { %709 = vmatpush3.msk.msra.mxu0 %vm39_vm1, %v28_v14 }
  0x15   :  { %711 = vmatmul.mubr.msk.f32.vlgmr.msra.gmra.mrb[0].mxu0 %vm35_vm2, %v34_v15  ;;  %vm645_vm2 = vcmask 58368  }
  0xe8   :  { %v109_v17 = vpop.f32.mrb[0].mxu0 }
  0xe9   :  { %v669_v18 = vmul.f32 -1.442695, %v109_v17  ;;  %v712_v19 = vpop.f32.mrb[1].mxu0 }
  0xeb   :  { %786 = vpow2.f32 %v669_v18 }
  0xf5   :  { %v787_v20 = vpop.eup %786 }
  0xf6   :  { %v117_v21 = vadd.f32 1.0, %v787_v20  ;;  %v282_v20 = vld [vmem:[%s1106_s1] sm:$0x3] }
  0xf8   :  { %788 = vrcp.f32 %v117_v21 }
  0xf9   :  { %790 = vtanh.f32 %v109_v17 }
 0x102   :  { %v789_v22 = vpop.eup %788 }
 0x103   :  { %121 = vrot.lane.b32.xlu0 %v789_v22, %s820_s13  ;;  %v791_v32 = vpop.eup %790 }
 0x107   :  { %128 = vperm.xlu0 %774, %v126_v24   ;;  %v324_v24 = vlaneseq }
 0x109   :  { %v1019_v31 = vand.u32 127, %v324_v24 }
 0x10b   :  { %775 = vset.pattern.permute.xlu0 %v823_v39 }
 0x175   :  { %v122_v33 = vpop.permute.xlu0 %121 }
 0x176   :  { %v124_v34 = vmul.f32 %v791_v32, %v122_v33  ;;  %v1021_v32 = vshrl.u32 %v324_v24, 7 }
 0x178   :  { %132 = vrot.lane.b32.xlu1 %v124_v34, %s822_s21 }
 0x186   :  { %v129_v35 = vpop.permute.xlu0 %128 }
 0x187   :  { %vm130_vm4 = vcmp.eq.s32.totalorder %v129_v35, 1 }
 0x1ea   :  { %v133_v36 = vpop.permute.xlu1 %132 }
 0x1eb   :  { %v930_v37 = vsel %vm130_vm4, %v124_v34, %v133_v36  ;;  %vm656_vm4 = vcmask 353376  }
 0x1ec   :  { %137 = vrot.lane.b32.xlu1 %v930_v37, %s822_s21 }
 0x25e   :  { %v138_v38 = vpop.permute.xlu1 %137 }
 0x25f   :  { %722 = vmatmul.mubr.msk.f32.vlgmr.msra.gmra.mrb[0].mxu1 %vm139_vm5, %v138_v38  ;;  %v328_v38 = vsub.s32 %v1019_v31, %v1021_v32 }
 0x260   :  { %732 = vmatprep.mubr.msk.f32.mxu1 %vm817_vm0, %v818_v4  ;;  %vm458_vm0 = vcmask 517376  }
 0x332   :  { %v956_v44 = vpop.f32.mrb[0].mxu1 }
 0x333   :  { %v723_v46 = vpop.f32.mrb[1].mxu1  ;;  %v221_v47 = vadd.f32 %v939_v40, %v956_v44  ;;  %v220_v48 = vadd.f32 %v944_v41, %v956_v44  ;;  %v222_v49 = vadd.f32 %v949_v42, %v956_v44  ;;  %v223_v51 = vadd.f32 %v954_v43, %v956_v44 }
 0x334   :  { %v224_v52 = vadd.f32 %v961_v45, %v956_v44  ;;  %v225_v53 = vadd.f32 %v972_v50, %v956_v44  ;;  %v226_v56 = vadd.f32 %v983_v54, %v956_v44  ;;  %v227_v57 = vadd.f32 %v988_v55, %v956_v44 }
 0x335   :  { %792 = vtanh.f32 %v221_v47 }
 0x336   :  { %794 = vtanh.f32 %v220_v48 }
 0x337   :  { %796 = vtanh.f32 %v222_v49 }
 0x338   :  { %798 = vtanh.f32 %v223_v51 }
 0x339   :  { %800 = vtanh.f32 %v224_v52 }
 0x33a   :  { %802 = vtanh.f32 %v225_v53 }
 0x33b   :  { %804 = vtanh.f32 %v226_v56 }
 0x33c   :  { %806 = vtanh.f32 %v227_v57 }
 0x33f   :  { %v793_v59 = vpop.eup %792 }
 0x340   :  { %v795_v60 = vpop.eup %794  ;;  %v237_v61 = vmul.f32 %v793_v59, %v997_v58 }
 0x341   :  { %v797_v62 = vpop.eup %796  ;;  %v236_v63 = vmul.f32 %v795_v60, %v997_v58 }
 0x342   :  { %v799_v1 = vpop.eup %798  ;;  %v248_v2 = vsel %vm244_vm6, %v237_v61, 0.0  ;;  %v238_v3 = vmul.f32 %v797_v62, %v997_v58 }
 0x343   :  { %v801_v4 = vpop.eup %800  ;;  %249 = vadd.xlane.f32.xlu0 %v248_v2  ;;  %v245_v5 = vsel %vm244_vm6, %v236_v63, 0.0  ;;  %v239_v6 = vmul.f32 %v799_v1, %v997_v58 }
 0x344   :  { %v803_v7 = vpop.eup %802  ;;  %246 = vadd.xlane.f32.xlu1 %v245_v5  ;;  %v251_v8 = vsel %vm244_vm6, %v238_v3, 0.0  ;;  %v240_v9 = vmul.f32 %v801_v4, %v997_v58 }
 0x345   :  { %v805_v10 = vpop.eup %804  ;;  %v254_v11 = vsel %vm244_vm6, %v239_v6, 0.0  ;;  %v241_v12 = vmul.f32 %v803_v7, %v997_v58 }
 0x346   :  { %v807_v13 = vpop.eup %806  ;;  %v257_v14 = vsel %vm244_vm6, %v240_v9, 0.0  ;;  %v242_v15 = vmul.f32 %v805_v10, %v997_v58 }
 0x347   :  { %252 = vadd.xlane.f32.xlu0 %v251_v8  ;;  %v260_v16 = vsel %vm244_vm6, %v241_v12, 0.0  ;;  %v243_v17 = vmul.f32 %v807_v13, %v997_v58 }
 0x348   :  { %255 = vadd.xlane.f32.xlu1 %v254_v11  ;;  %v263_v18 = vsel %vm244_vm6, %v242_v15, 0.0 }
 0x349   :  { %v266_v19 = vsel %vm244_vm6, %v243_v17, 0.0 }
 0x34b   :  { %258 = vadd.xlane.f32.xlu0 %v257_v14 }
 0x34c   :  { %261 = vadd.xlane.f32.xlu1 %v260_v16 }
 0x34f   :  { %264 = vadd.xlane.f32.xlu0 %v263_v18 }
 0x350   :  { %267 = vadd.xlane.f32.xlu1 %v266_v19 }
 0x365   :  { %271 = vperm.xlu0 %775, %v997_v58  }
 0x383   :  { %283 = vxpose.xlu1.b32.start.end [1/1] (short) (narrow) %v282_v20, 8 }
 0x3d0   :  { %v250_v21 = vpop.xlane.xlu0 %249 }
 0x3d1   :  { %v247_v34 = vpop.xlane.xlu1 %246 }
 0x3d4   :  { %v253_v22 = vpop.xlane.xlu0 %252 }
 0x3d5   :  { %v256_v48 = vpop.xlane.xlu1 %255 }
 0x3d8   :  { %v259_v23 = vpop.xlane.xlu0 %258 }
 0x3d9   :  { %v262_v59 = vpop.xlane.xlu1 %261 }
 0x3dc   :  { %v265_v29 = vpop.xlane.xlu0 %264 }
 0x3dd   :  { %v268_v3 = vpop.xlane.xlu1 %267 }
 0x3e4   :  { %v272_v33 = vpop.permute.xlu0 %271 }
 0x3e5   :  { %v274_v35 = vadd.f32 %v272_v33, %v247_v34  ;;  %v275_v36 = vadd.f32 %v272_v33, %v250_v21  ;;  %v276_v39 = vadd.f32 %v272_v33, %v253_v22  ;;  %v277_v51 = vadd.f32 %v272_v33, %v256_v48 }
 0x3e6   :  { %v278_v53 = vadd.f32 %v272_v33, %v259_v23  ;;  %v279_v60 = vadd.f32 %v272_v33, %v262_v59  ;;  %v280_v63 = vadd.f32 %v272_v33, %v265_v29  ;;  %v281_v4 = vadd.f32 %v272_v33, %v268_v3 }
 0x3e7   :  { %v329_v46 = vrot.slane %v274_v35, %v328_v38  ;;  %v333_v47 = vrot.slane %v275_v36, %v328_v38  ;;  %v337_v49 = vrot.slane %v276_v39, %v328_v38  ;;  %v341_v57 = vrot.slane %v277_v51, %v328_v38 }
 0x3e8   :  { %v345_v62 = vrot.slane %v278_v53, %v328_v38  ;;  %v349_v2 = vrot.slane %v279_v60, %v328_v38  ;;  %v353_v6 = vrot.slane %v280_v63, %v328_v38  ;;  %v357_v8 = vrot.slane %v281_v4, %v328_v38 }
 0x3e9   :  { %v359_v52 = vsel %vm358_vm7, %v333_v47, %v329_v46  ;;  %v417_v36 = vsub.s32 3, %v1021_v32  ;;  %v1030_v38 = vsub.s32 0, %v1021_v32  ;;  %v431_v59 = vsub.s32 5, %v1021_v32 }
 0x3ea   :  { %v361_v56 = vsel %vm360_vm8, %v337_v49, %v359_v52  ;;  %v403_v49 = vsub.s32 1, %v1021_v32  ;;  %v410_v52 = vsub.s32 2, %v1021_v32  ;;  %v445_v63 = vsub.s32 7, %v1021_v32 }
 0x3eb   :  { %v363_v61 = vsel %vm362_vm9, %v341_v57, %v361_v56  ;;  %v424_v56 = vsub.s32 4, %v1021_v32 }
 0x3ec   :  { %v365_v1 = vsel %vm364_vm10, %v345_v62, %v363_v61  ;;  %v438_v61 = vsub.s32 6, %v1021_v32 }
 0x3ed   :  { %v367_v5 = vsel %vm366_vm11, %v349_v2, %v365_v1  ;;  %v781_v2 = vpack.i.bf16 %v924_v30, %v915_v27 }
 0x3ee   :  { %v369_v7 = vsel %vm368_vm12, %v353_v6, %v367_v5 }
 0x3ef   :  { %v371_v10 = vsel %vm370_vm13, %v357_v8, %v369_v7 }
 0x403   :  { %v299_v9 = vpop.trf.xlu1 }
 0x404   :  { %vm315_vm15 = vcmp.gt.f32.partialorder %v299_v9, 0.5 }
 0x405   :  { %v373_v11 = vsel %vm315_vm15, -1e+12, %v371_v10 }
 0x406   :  { %v375_v12 = vsel %vm374_vm14, %v373_v11, -inf }
 0x407   :  { %v376_v13 = vrot.slane %v375_v12, 4 }
 0x409   :  { %v377_v14 = vmax.f32 %v375_v12, %v376_v13 }
 0x40b   :  { %v378_v15 = vrot.slane %v377_v14, 2 }
 0x40d   :  { %v379_v16 = vmax.f32 %v377_v14, %v378_v15 }
 0x40f   :  { %v380_v17 = vrot.slane %v379_v16, 1 }
 0x411   :  { %v381_v18 = vmax.f32 %v379_v16, %v380_v17 }
 0x413   :  { %v382_v19 = vsub.f32 %v373_v11, %v381_v18 }
 0x415   :  { %v383_v20 = vmul.f32 1.442695, %v382_v19 }
 0x417   :  { %808 = vpow2.f32 %v383_v20 }
 0x421   :  { %v809_v21 = vpop.eup %808 }
 0x422   :  { %v385_v22 = vsel %vm374_vm14, %v809_v21, 0.0 }
 0x423   :  { %v386_v23 = vrot.slane %v385_v22, 4 }
 0x425   :  { %v387_v24 = vadd.f32 %v386_v23, %v385_v22 }
 0x427   :  { %v388_v29 = vrot.slane %v387_v24, 2 }
 0x429   :  { %v389_v33 = vadd.f32 %v388_v29, %v387_v24 }
 0x42b   :  { %v390_v34 = vrot.slane %v389_v33, 1 }
 0x42d   :  { %v391_v35 = vadd.f32 %v390_v34, %v389_v33 }
 0x42f   :  { %810 = vrcp.f32 %v391_v35 }
 0x439   :  { %v811_v39 = vpop.eup %810 }
 0x43a   :  { %v393_v46 = vmul.f32 %v811_v39, %v809_v21 }
 0x43c   :  { %v418_v47 = vrot.slane %v393_v46, %v417_v36  ;;  %v397_v48 = vrot.slane %v393_v46, %v1030_v38  ;;  %v404_v51 = vrot.slane %v393_v46, %v403_v49  ;;  %v411_v53 = vrot.slane %v393_v46, %v410_v52 }
 0x43d   :  { %v425_v57 = vrot.slane %v393_v46, %v424_v56  ;;  %v432_v60 = vrot.slane %v393_v46, %v431_v59  ;;  %v439_v62 = vrot.slane %v393_v46, %v438_v61  ;;  %v446_v1 = vrot.slane %v393_v46, %v445_v63  ;;  %v572_v63 = vld [vmem:[%s1107_s3 + $0x8] sm:$0xff] }
 0x43e   :  { %420 = vbcast.lane.b32.xlu1 %v418_v47, 256  ;;  %399 = vbcast.lane.b32.xlu0 %v397_v48, 256  ;;  %v826_v47 = vmov 1966171168  }
 0x43f   :  { %v575_v48 = vunpack.c.l.s4 %v826_v47 }
 0x441   :  { %v576_v49 = vunpack.c.0.s8 %v575_v48 }
 0x442   :  { %406 = vbcast.lane.b32.xlu0 %v404_v51, 256 }
 0x443   :  { %v579_v51 = vsub.s32 %v576_v49, %v1021_v32 }
 0x446   :  { %413 = vbcast.lane.b32.xlu0 %v411_v53, 256 }
 0x44a   :  { %427 = vbcast.lane.b32.xlu0 %v425_v57, 256 }
 0x44e   :  { %434 = vbcast.lane.b32.xlu0 %v432_v60, 256 }
 0x452   :  { %441 = vbcast.lane.b32.xlu0 %v439_v62, 256  ;;  %v571_v62 = vld [vmem:[%s1107_s3] sm:$0xff]  ;;  %s828_s3 = smov 76  }
 0x456   :  { %448 = vbcast.lane.b32.xlu0 %v446_v1, 256 }
 0x45a   :  { %777 = vrot.lane.b32.xlu0 %v776_v28, %s824_s15 }
 0x45e   :  { %782 = vrot.lane.b32.xlu0 %v781_v2, %s824_s15 }
 0x4b0   :  { %v400_v3 = vpop.permute.xlu0 %399  ;;  %v421_v10 = vpop.permute.xlu1 %420 }
 0x4b1   :  { %v450_v6 = vmul.f32 %v400_v3, %v944_v41  ;;  %v453_v30 = vmul.f32 %v421_v10, %v954_v43 }
 0x4b3   :  { %v459_v25 = vsel %vm458_vm0, %v450_v6, 0.0  ;;  %v464_v41 = vsel %vm458_vm0, %v453_v30, 0.0 }
 0x4b4   :  { %v407_v4 = vpop.permute.xlu0 %406 }
 0x4b5   :  { %v451_v5 = vmul.f32 %v407_v4, %v939_v40 }
 0x4b7   :  { %v460_v8 = vsel %vm458_vm0, %v451_v5, 0.0 }
 0x4b8   :  { %v414_v7 = vpop.permute.xlu0 %413  ;;  %v461_v28 = vadd.f32 %v460_v8, %v459_v25  ;;  %v629_v25 = vadd.s32 4294967288, %v1019_v31 }
 0x4b9   :  { %v452_v9 = vmul.f32 %v414_v7, %v949_v42 }
 0x4bb   :  { %v462_v26 = vsel %vm458_vm0, %v452_v9, 0.0 }
 0x4bc   :  { %v428_v27 = vpop.permute.xlu0 %427  ;;  %v463_v11 = vadd.f32 %v462_v26, %v461_v28  ;;  %v632_v26 = vsub.s32 %v629_v25, %v1021_v32  ;;  %v625_v28 = vld [vmem:[%s1106_s1] sm:$0x3] }
 0x4bd   :  { %v454_v40 = vmul.f32 %v428_v27, %v961_v45  ;;  %vm626_vm1 = vcmp.gt.f32.partialorder %v625_v28, 0.5 }
 0x4be   :  { %v465_v14 = vadd.f32 %v464_v41, %v463_v11 }
 0x4bf   :  { %v466_v42 = vsel %vm458_vm0, %v454_v40, 0.0 }
 0x4c0   :  { %v435_v12 = vpop.permute.xlu0 %434  ;;  %v467_v18 = vadd.f32 %v466_v42, %v465_v14 }
 0x4c1   :  { %v455_v13 = vmul.f32 %v435_v12, %v972_v50 }
 0x4c3   :  { %v468_v16 = vsel %vm458_vm0, %v455_v13, 0.0 }
 0x4c4   :  { %v442_v15 = vpop.permute.xlu0 %441  ;;  %v469_v43 = vadd.f32 %v468_v16, %v467_v18 }
 0x4c5   :  { %v456_v17 = vmul.f32 %v442_v15, %v983_v54 }
 0x4c7   :  { %v470_v19 = vsel %vm458_vm0, %v456_v17, 0.0 }
 0x4c8   :  { %v449_v20 = vpop.permute.xlu0 %448  ;;  %v471_v21 = vadd.f32 %v470_v19, %v469_v43 }
 0x4c9   :  { %v457_v45 = vmul.f32 %v449_v20, %v988_v55 }
 0x4cb   :  { %v472_v22 = vsel %vm458_vm0, %v457_v45, 0.0 }
 0x4cc   :  { %v1060_v23 = vadd.f32 %v472_v22, %v471_v21  ;;  %v778_v50 = vpop.permute.xlu0 %777 }
 0x4cd   :  { %v780_v24 = vunpack.i.h.bf16 %v778_v50  ;;  %v779_v29 = vunpack.i.l.bf16 %v778_v50 }
 0x4ce   :  { %475 = vrot.lane.b32.xlu0 %v1060_v23, %s820_s13 }
 0x4cf   :  { %v754_v33 = vpack.c.bf16 %v780_v24, %v779_v29 }
 0x4d0   :  { %v783_v54 = vpop.permute.xlu0 %782 }
 0x4d1   :  { %v785_v34 = vunpack.i.h.bf16 %v783_v54  ;;  %v784_v35 = vunpack.i.l.bf16 %v783_v54  ;;  %755 = vmatpush3.bf16.msra.mxu1 %v754_v33 }
 0x4d2   :  { %756 = vmatprep.subr.bf16.mxu1 %v816_v0 }
 0x4d3   :  { %v757_v36 = vpack.c.bf16 %v785_v34, %v784_v35 }
 0x4d5   :  { %758 = vmatpush3.bf16.msra.mxu1 %v757_v36 }
 0x540   :  { %v476_v55 = vpop.permute.xlu0 %475 }
 0x541   :  { %733 = vmatmul.mubr.msk.f32.vlgmr.msra.gmra.mrb[2].mxu1 %vm139_vm5, %v476_v55 }
 0x614   :  { %v561_v39 = vpop.f32.mrb[2].mxu1 }
 0x615   :  { %566 = vrot.lane.b32.xlu1 %v561_v39, %s825_s16  ;;  %v734_v46 = vpop.f32.mrb[3].mxu1 }
 0x687   :  { %v567_v52 = vpop.permute.xlu1 %566 }
 0x688   :  { %v569_v53 = vadd.f32 %v567_v52, %v956_v44 }
 0x68a   :  { %v580_v56 = vrot.slane %v569_v53, %v579_v51  ;;  %v570_v10 = vadd.f32 %v569_v53, %v997_v58 }
 0x68c   :  { %v581_v57 = vcombine.high %v580_v56, %v580_v56  ;;  %v588_v0 = vrot.slane %v580_v56, %v579_v51 }
 0x68e   :  { %v599_v59 = vrot.slane %v588_v0, %v1030_v38  ;;  %v595_v60 = vrot.slane %v581_v57, %v579_v51 }
 0x690   :  { %604 = vrot.lane.b32.xlu0 %v599_v59, %s820_s13  ;;  %v603_v61 = vrot.slane %v595_v60, %v1030_v38 }
 0x692   :  { %606 = vrot.lane.b32.xlu1 %v603_v61, %s820_s13 }
 0x694   :  { %614 = vrot.lane.b32.xlu0 %v997_v58, %s820_s13  ;;  %s827_s13 = smov 72  }
 0x702   :  { %v605_v44 = vpop.permute.xlu0 %604 }
 0x703   :  { %v610_v1 = vadd.f32 %v605_v44, %v571_v62 }
 0x704   :  { %v607_v2 = vpop.permute.xlu1 %606 }
 0x705   :  { %812 = vtanh.f32 %v610_v1  ;;  %v611_v3 = vadd.f32 %v607_v2, %v572_v63 }
 0x706   :  { %v615_v38 = vpop.permute.xlu0 %614 }
 0x707   :  { %814 = vtanh.f32 %v611_v3 }
 0x70f   :  { %v813_v4 = vpop.eup %812 }
 0x710   :  { %v617_v5 = vmul.f32 %v813_v4, %v615_v38 }
 0x711   :  { %v815_v6 = vpop.eup %814 }
 0x712   :  { %v618_v7 = vmul.f32 %v815_v6, %v615_v38  ;;  %v619_v8 = vsel %vm139_vm5, %v617_v5, 0.0 }
 0x713   :  { %620 = vadd.xlane.f32.xlu1 %v619_v8 }
 0x714   :  { %v622_v9 = vsel %vm139_vm5, %v618_v7, 0.0  ;;  %vm661_vm5 = vcmask 615776  }
 0x715   :  { %623 = vadd.xlane.f32.xlu0 %v622_v9 }
 0x724   :  { %648 = vrot.lane.b32.xlu1 %v570_v10, %s827_s13 }
 0x728   :  { %653 = vrot.lane.b32.xlu1 %v930_v37, %s828_s3 }
 0x7a0   :  { %v621_v27 = vpop.xlane.xlu1 %620 }
 0x7a1   :  { %v633_v11 = vrot.slane %v621_v27, %v632_v26 }
 0x7a2   :  { %v624_v30 = vpop.xlane.xlu0 %623 }
 0x7a3   :  { %v637_v40 = vrot.slane %v624_v30, %v632_v26 }
 0x7a4   :  { %v649_v37 = vpop.permute.xlu1 %648 }
 0x7a5   :  { %v638_v58 = vsel %vm358_vm7, %v637_v40, %v633_v11 }
 0x7a6   :  { %v640_v12 = vsel %vm626_vm1, -1e+12, %v638_v58 }
 0x7a7   :  { %642 = vrot.lane.b32.xlu0 %v640_v12, %s829_s23 }
 0x7a8   :  { %v654_v32 = vpop.permute.xlu1 %653 }
 0x7ab   :  { %658 = vrot.lane.b32.xlu0 %v1060_v23, %s830_s24 }
 0x819   :  { %v643_v31 = vpop.permute.xlu0 %642 }
 0x81a   :  { %646 = vst.msk [vmem:[%s1108_s5] sm:$0x3] %vm645_vm2, %v643_v31 }
 0x81b   :  { %652 = vst.msk [vmem:[%s1108_s5] sm:$0x3] %vm651_vm3, %v649_v37 }
 0x81c   :  { %657 = vst.msk [vmem:[%s1108_s5] sm:$0x3] %vm656_vm4, %v654_v32 }
 0x81d   :  { %v659_v41 = vpop.permute.xlu0 %658 }
 0x81e   :  { %662 = vst.msk [vmem:[%s1108_s5] sm:$0x3] %vm661_vm5, %v659_v41 }

</bundles_post_ra>
